<compile_context>
chip_gen: v7x
topology: tpu7x:2x2x1
jax: 0.10.0
libtpu: 0.0.40
codegen_flags: <defaults>
</compile_context>

<pallas_src>
import functools
import math

import jax
import jax.numpy as jnp
from jax import lax
from jax.experimental import pallas as pl
from jax.experimental.pallas import tpu as pltpu


def _round_up(x, m):
    return (x + m - 1) // m * m


def _vmem_budget_bytes():
    """~80% of physical VMEM per TensorCore; conservative fallback if unknown."""
    cap = 64 << 20                      # safe for every listed generation (v7x = 64 MiB)
    try:
        info = pltpu.get_tpu_info()
        cap = int(getattr(info, "vmem_capacity_bytes", cap)) or cap
    except Exception:
        pass
    return int(cap * 0.8)


# ----------------------------------------------------------------------------
# Kernels
# ----------------------------------------------------------------------------
def _fc_l2norm_kernel(x_ref, w_ref, b_ref, o_ref, *, do_norm, eps):
    """Single-K-step path.  x:(tm,K) bf16; w:(N,K) bf16 (VMEM-resident); b:(1,N) f32."""
    feat = lax.dot_general(
        x_ref[...], w_ref[...],
        dimension_numbers=(((1,), (1,)), ((), ())),   # x @ w.T without a wrapper transpose
        preferred_element_type=jnp.float32,
    ) + b_ref[...]
    if do_norm:
        # Matches torch l2norm: norm = sqrt(sum(x^2)) + eps ; x = x / norm
        norm = jnp.sqrt(jnp.sum(feat * feat, axis=-1, keepdims=True)) + eps
        feat = feat * pl.reciprocal(norm, approx=True)   # EUP reciprocal, VALU-free
    o_ref[...] = feat.astype(o_ref.dtype)


def _fc_l2norm_kernel_ktiled(x_ref, w_ref, b_ref, o_ref, acc_ref, *, do_norm, eps):
    """Fallback for huge img_dim (W cannot stay resident).  x:(tm,tk); w:(N,tk)."""
    k = pl.program_id(1)

    @pl.when(k == 0)
    def _():
        acc_ref[...] = jnp.zeros_like(acc_ref)

    acc_ref[...] += lax.dot_general(
        x_ref[...], w_ref[...],
        dimension_numbers=(((1,), (1,)), ((), ())),
        preferred_element_type=jnp.float32,
    )

    @pl.when(k == pl.num_programs(1) - 1)
    def _():
        feat = acc_ref[...] + b_ref[...]
        if do_norm:
            norm = jnp.sqrt(jnp.sum(feat * feat, axis=-1, keepdims=True)) + eps
            feat = feat * pl.reciprocal(norm, approx=True)
        o_ref[...] = feat.astype(o_ref.dtype)


# ----------------------------------------------------------------------------
# Forward wrapper
# ----------------------------------------------------------------------------
def encoder_image_precomp_forward(images, w, b, no_imgnorm=False,
                                  *, compute_dtype=jnp.bfloat16, eps=1e-8):
    """images: (..., img_dim); w: (embed_size, img_dim); b: (embed_size,)."""
    orig_lead = images.shape[:-1]
    img_dim = images.shape[-1]
    embed_size = w.shape[0]

    x = images.reshape(-1, img_dim).astype(compute_dtype)
    w_c = w.astype(compute_dtype)
    b2d = b.reshape(1, embed_size).astype(jnp.float32)

    M = x.shape[0]
    isz = jnp.dtype(compute_dtype).itemsize
    budget = _vmem_budget_bytes()
    do_norm = not no_imgnorm

    # ---------- primary plan: single K step, W resident in VMEM -------------
    w_bytes = 2 * embed_size * img_dim * isz            # double-buffer accounting
    fixed = w_bytes + 2 * embed_size * 4                # + bias
    tm_eff = None
    for tm in (512, 256, 128, 64, 32, 16, 8):
        per_tile = 2 * tm * img_dim * isz + 2 * tm * embed_size * 4
        if fixed + per_tile <= budget:
            tm_eff = tm
            break

    if tm_eff is not None:
        # Prefer >= 2 M tiles so the "parallel" axis can shard across dual-TC chips.
        if M > 8:
            tm_eff = min(tm_eff, max(8, _round_up((M + 1) // 2, 8)))
        tm_eff = max(8, min(tm_eff, _round_up(M, 8)))
        M_pad = _round_up(M, tm_eff)
        if M_pad != M:
            x = jnp.pad(x, ((0, M_pad - M), (0, 0)))     # rows only; no K padding needed

        work = (2 * tm_eff * img_dim * isz + w_bytes
                + 2 * tm_eff * embed_size * 4 + 2 * embed_size * 4)
        vmem_limit = int(min(max(work * 3 // 2, 4 << 20), budget))

        kernel = functools.partial(_fc_l2norm_kernel, do_norm=do_norm, eps=eps)
        out = pl.pallas_call(
            kernel,
            out_shape=jax.ShapeDtypeStruct((M_pad, embed_size), jnp.float32),
            grid_spec=pltpu.PrefetchScalarGridSpec(
                num_scalar_prefetch=0,
                grid=(M_pad // tm_eff,),
                in_specs=[
                    pl.BlockSpec((tm_eff, img_dim), lambda i: (i, 0)),
                    pl.BlockSpec((embed_size, img_dim), lambda i: (0, 0)),  # resident W
                    pl.BlockSpec((1, embed_size), lambda i: (0, 0)),
                ],
                out_specs=pl.BlockSpec((tm_eff, embed_size), lambda i: (i, 0)),
            ),
            compiler_params=pltpu.CompilerParams(
                dimension_semantics=("parallel",),
                vmem_limit_bytes=vmem_limit,
            ),
        )(x, w_c, b2d)
    else:
        # ---------- fallback: K-tiled reduction with f32 accumulator --------
        tk_eff, tm_eff, found = 128, 8, False
        for tk in (2048, 1024, 512, 256, 128):
            fixed_k = 2 * embed_size * tk * isz + 2 * embed_size * 4
            for tm in (512, 256, 128, 64, 32, 16, 8):
                per_tile = (2 * tm * tk * isz + 2 * tm * embed_size * 4
                            + tm * embed_size * 4)       # + acc scratch
                if fixed_k + per_tile <= budget:
                    tk_eff, tm_eff, found = tk, tm, True
                    break
            if found:
                break

        K_pad = _round_up(img_dim, tk_eff)
        M_pad = _round_up(M, tm_eff)
        if M_pad != M or K_pad != img_dim:
            x = jnp.pad(x, ((0, M_pad - M), (0, K_pad - img_dim)))
        if K_pad != img_dim:
            w_c = jnp.pad(w_c, ((0, 0), (0, K_pad - img_dim)))

        kernel = functools.partial(_fc_l2norm_kernel_ktiled, do_norm=do_norm, eps=eps)
        out = pl.pallas_call(
            kernel,
            out_shape=jax.ShapeDtypeStruct((M_pad, embed_size), jnp.float32),
            grid_spec=pltpu.PrefetchScalarGridSpec(
                num_scalar_prefetch=0,
                grid=(M_pad // tm_eff, K_pad // tk_eff),
                in_specs=[
                    pl.BlockSpec((tm_eff, tk_eff), lambda i, k: (i, k)),
                    pl.BlockSpec((embed_size, tk_eff), lambda i, k: (0, k)),
                    pl.BlockSpec((1, embed_size), lambda i, k: (0, 0)),
                ],
                out_specs=pl.BlockSpec((tm_eff, embed_size), lambda i, k: (i, 0)),
                scratch_shapes=[pltpu.VMEM((tm_eff, embed_size), jnp.float32)],
            ),
            compiler_params=pltpu.CompilerParams(
                dimension_semantics=("parallel", "arbitrary"),
                vmem_limit_bytes=int(budget),
            ),
        )(x, w_c, b2d)

    out = out[:M]
    return out.reshape(*orig_lead, embed_size)


# ----------------------------------------------------------------------------
# Parameter init (mirrors EncoderImagePrecomp.init_weights: Xavier uniform, b=0)
# ----------------------------------------------------------------------------
def init_params(key, img_dim, embed_size):
    r = math.sqrt(6.0) / math.sqrt(img_dim + embed_size)
    w = jax.random.uniform(key, (embed_size, img_dim),
                           minval=-r, maxval=r, dtype=jnp.float32)
    b = jnp.zeros((embed_size,), jnp.float32)
    return {"fc_w": w, "fc_b": b}
# TODO(synk): load_state_dict filtering is host-side checkpoint plumbing, not a kernel.


# ----------------------------------------------------------------------------
# Pure-JAX f32 reference (for correctness check)
# ----------------------------------------------------------------------------
def _reference(images, w, b, no_imgnorm):
    feat = images.astype(jnp.float32) @ w.T.astype(jnp.float32) + b
    if not no_imgnorm:
        norm = jnp.sqrt(jnp.sum(feat * feat, axis=-1, keepdims=True)) + 1e-8
        feat = feat / norm
    return feat


# ----------------------------------------------------------------------------
if __name__ == "__main__":
    img_dim = 32
    embed_size = 32

    B, R = 2, 4            # batch of 2, 4 precomputed region features each
    key = jax.random.PRNGKey(0)
    k_param, k_img = jax.random.split(key)

    params = init_params(k_param, img_dim, embed_size)
    images = jax.random.normal(k_img, (B, R, img_dim), dtype=jnp.float32)

    for no_imgnorm in (False, True):
        feats = encoder_image_precomp_forward(
            images, params["fc_w"], params["fc_b"], no_imgnorm=no_imgnorm)
        feats = jax.block_until_ready(feats)
        assert feats.shape == (B, R, embed_size)

        ref = _reference(images, params["fc_w"], params["fc_b"], no_imgnorm)
        # bf16 MXU inputs + approx reciprocal -> relaxed tolerance vs f32 reference.
        assert jnp.allclose(feats, ref, atol=2e-2, rtol=2e-2), \
            f"mismatch vs reference (no_imgnorm={no_imgnorm})"

    print("KERNEL_OK")
</pallas_src>

<mosaic_0001>
module attributes {stable_mosaic.version = 11 : i64} {
  func.func @_fc_l2norm_kernel(%arg0: i32, %arg1: memref<8x32xbf16, #tpu.memory_space<vmem>>, %arg2: memref<32x32xbf16, #tpu.memory_space<vmem>>, %arg3: memref<1x32xf32, #tpu.memory_space<vmem>>, %arg4: memref<8x32xf32, #tpu.memory_space<vmem>>) attributes {dimension_semantics = [#tpu.dimension_semantics<parallel>], iteration_bounds = array<i64: 1>, scalar_prefetch = 0 : i64, scratch_operands = 0 : i64, tpu.core_type = #tpu.core_type<tc>, window_params = [{transform_indices = @transform_0, window_bounds = array<i64: 8, 32>}, {pipeline_mode = #tpu.pipeline_mode<synchronous>, transform_indices = @transform_1, window_bounds = array<i64: 32, 32>}, {pipeline_mode = #tpu.pipeline_mode<synchronous>, transform_indices = @transform_2, window_bounds = array<i64: 1, 32>}, {transform_indices = @transform_3, window_bounds = array<i64: 8, 32>}]} {
    %c0 = arith.constant 0 : index
    %c0_0 = arith.constant 0 : index
    %0 = vector.load %arg1[%c0, %c0_0] : memref<8x32xbf16, #tpu.memory_space<vmem>>, vector<8x32xbf16>
    %c0_1 = arith.constant 0 : index
    %c0_2 = arith.constant 0 : index
    %1 = vector.load %arg2[%c0_1, %c0_2] : memref<32x32xbf16, #tpu.memory_space<vmem>>, vector<32x32xbf16>
    %cst = arith.constant dense<0.000000e+00> : vector<8x32xf32>
    %2 = tpu.matmul %0, %1, %cst {dimension_numbers = #tpu.dot_dimension_numbers<[1], [1], [0], [0], [0, 0, 1, 0], [], []>} : vector<8x32xbf16>, vector<32x32xbf16>, vector<8x32xf32> -> vector<8x32xf32>
    %c0_3 = arith.constant 0 : index
    %c0_4 = arith.constant 0 : index
    %3 = vector.load %arg3[%c0_3, %c0_4] : memref<1x32xf32, #tpu.memory_space<vmem>>, vector<1x32xf32>
    %4 = vector.broadcast %3 : vector<1x32xf32> to vector<8x32xf32>
    %5 = arith.addf %2, %4 : vector<8x32xf32>
    %6 = arith.mulf %5, %5 : vector<8x32xf32>
    %cst_5 = arith.constant dense<0.000000e+00> : vector<8xf32>
    %7 = vector.multi_reduction <add>, %6, %cst_5 [1] : vector<8x32xf32> to vector<8xf32>
    %8 = vector.shape_cast %7 : vector<8xf32> to vector<8x1xf32>
    %9 = math.sqrt %8 : vector<8x1xf32>
    %cst_6 = arith.constant 9.99999993E-9 : f32
    %10 = vector.broadcast %cst_6 : f32 to vector<8x1xf32>
    %11 = arith.addf %9, %10 : vector<8x1xf32>
    %12 = tpu.reciprocal %11 {approx = true} : vector<8x1xf32> -> vector<8x1xf32>
    %13 = vector.broadcast %12 : vector<8x1xf32> to vector<8x32xf32>
    %14 = arith.mulf %5, %13 : vector<8x32xf32>
    %c0_7 = arith.constant 0 : index
    %c0_8 = arith.constant 0 : index
    %15 = vector.load %arg4[%c0_7, %c0_8] : memref<8x32xf32, #tpu.memory_space<vmem>>, vector<8x32xf32>
    tpu.vector_store %arg4[%c0_7, %c0_8], %14 {strides = array<i32>} : memref<8x32xf32, #tpu.memory_space<vmem>>, vector<8x32xf32>,
    return
  }
  func.func @transform_0(%arg0: i32) -> (i32, i32) {
    %c0_i32 = arith.constant 0 : i32
    %c0_i32_0 = arith.constant 0 : i32
    return %arg0, %c0_i32 : i32, i32
  }
  func.func @transform_1(%arg0: i32) -> (i32, i32) {
    %c0_i32 = arith.constant 0 : i32
    %c0_i32_0 = arith.constant 0 : i32
    %c0_i32_1 = arith.constant 0 : i32
    return %c0_i32, %c0_i32_0 : i32, i32
  }
  func.func @transform_2(%arg0: i32) -> (i32, i32) {
    %c0_i32 = arith.constant 0 : i32
    %c0_i32_0 = arith.constant 0 : i32
    %c0_i32_1 = arith.constant 0 : i32
    return %c0_i32, %c0_i32_0 : i32, i32
  }
  func.func @transform_3(%arg0: i32) -> (i32, i32) {
    %c0_i32 = arith.constant 0 : i32
    %c0_i32_0 = arith.constant 0 : i32
    return %arg0, %c0_i32 : i32, i32
  }
}

</mosaic_0001>

<bundles_post_ra>
// kernel: tpu_custom_call.1
= control target key start
LH: loop header
LB: loop body
LE: loop exit
PB: predicated region body
PF: predicated region fallthrough
CT: control target
= control target key end

     0   :  { %8 = vsyncpa [#allocation3], 0  ;;  %s323_s0 = inlined_call_operand.hbm [shape: bf16[8,32], index: 0, kind: input, shape index: {}]   ;;  %s324_s1 = inlined_call_operand.hbm [shape: bf16[32,32], index: 1, kind: input, shape index: {}]   ;;  %s325_s2 = inlined_call_operand.vmem [shape: f32[1,32], index: 2, kind: input, shape index: {}]   ;;  %s326_s3 = inlined_call_operand.hbm [shape: f32[8,32], index: 3, kind: output, shape index: {}]  }
   0x1   :  { %9 = vsyncpa [#allocation6], 0 }
   0x2   :  { %10 = vsyncpa [#allocation4], 0  ;;  %s245_s12 = smov [#allocation2]   ;;  %s246_s14 = smov [#allocation5]  }
   0x3   :  { %s17_s13 = sshll.u32 %s245_s12, 4  ;;  %s26_s15 = sshll.u32 %s246_s14, 4  ;;  %s18_s13 = int_to_ptr.vmem [resolvable:$true] %s17_s13  ;;  %s272_s15 = int_to_ptr.vmem [resolvable:$true] %s26_s15 }
   0x4   :  { %s173_s18 = scalar_lea.hbm %s323_s0, 64 }
   0x5   :  { %p174_p0 = scmp.ne.s32.totalorder %s323_s0, %s173_s18  ;;  %p177_p1 = scmp.lt.u32.totalorder %s173_s18, %s323_s0 }
   0x7   :  { %p179_p2 = pnand %p177_p1, %p174_p0 }
   0x9   :  { %182 = shalt.err (!%p179_p2)
}
   0xa   :  { %s183_s23 = scalar_lea.vmem %s18_s13, 64  ;;  %p188_p4 = scmp.lt.s32.totalorder %s18_s13, %s18_s13 }
   0xb   :  { %p184_p3 = scmp.ne.s32.totalorder %s18_s13, %s183_s23  ;;  %p189_p5 = scmp.lt.s32.totalorder %s183_s23, %s183_s23 }
   0xd   :  { %p190_p6 = por %p189_p5, %p188_p4 }
   0xf   :  { %p191_p7 = pnand %p190_p6, %p184_p3 }
  0x11   :  { %194 = shalt.err (!%p191_p7)
}
  0x12   :  { %20 = dma.hbm_to_vmem [thread:$0]  %s323_s0, 64, %s18_s13, [#allocation3]  }
  0x13   :  { %s195_s28 = scalar_lea.hbm %s324_s1, 256 }
  0x14   :  { %p196_p8 = scmp.ne.s32.totalorder %s324_s1, %s195_s28  ;;  %p199_p9 = scmp.lt.u32.totalorder %s195_s28, %s324_s1 }
  0x16   :  { %p201_p10 = pnand %p199_p9, %p196_p8 }
  0x18   :  { %204 = shalt.err (!%p201_p10)
}
  0x19   :  { %s205_s6 = scalar_lea.vmem %s272_s15, 256  ;;  %p210_p12 = scmp.lt.s32.totalorder %s272_s15, %s272_s15 }
  0x1a   :  { %p206_p11 = scmp.ne.s32.totalorder %s272_s15, %s205_s6  ;;  %p211_p13 = scmp.lt.s32.totalorder %s205_s6, %s205_s6 }
  0x1c   :  { %p212_p0 = por %p211_p13, %p210_p12 }
  0x1e   :  { %p213_p1 = pnand %p212_p0, %p206_p11 }
  0x20   :  { %216 = shalt.err (!%p213_p1)
}
  0x21   :  { %s247_s0 = smov 64   ;;  %s248_s7 = smov 4  }
  0x22   :  { %32 = dma.hbm_to_vmem [thread:$0]  %s324_s1, 256, %s272_s15, [#allocation6], %s247_s0, %s247_s0, %s248_s7  }
  0x23   :  { %239 = dma.done.wait [#allocation3], 64  }
  0x24   :  { %240 = vsyncadd [#allocation3], 4294967232 }
  0x25   :  { %241 = dma.done.wait [#allocation6], 256  }
  0x26   :  { %242 = vsyncadd [#allocation6], 4294967040  ;;  %v249_v0 = vmov 0.0   ;;  %vm250_vm0 = vmmov 0   ;;  %vm64_vm1 = vcmask 261120   ;;  %v167_v1 = vld [vmem:[#allocation5] sm:$0xff]  }
  0x27   :  { %152 = vmatprep.subr.bf16.mxu0 %v249_v0  ;;  %156 = vmatprep.mubr.msk.bf16.mxu0 %vm250_vm0, %v249_v0  ;;  %v69_v2 = vsel %vm64_vm1, %v167_v1, 0  ;;  %v168_v3 = vld [vmem:[#allocation5 + $0x8] sm:$0xff]   ;;  %v42_v5 = vld [vmem:[#allocation2] sm:$0xf] }
  0x28   :  { %153 = vmatpush3.bf16.xpose.msra.mxu0 %v69_v2  ;;  %v72_v4 = vsel %vm64_vm1, %v168_v3, 0  ;;  %v145_v6 = vld [vmem:[%s325_s2] ss:$0 sm:$0xff]  ;;  %s251_s2 = smov [#allocation7]  }
  0x29   :  { %154 = vmatprep.subr.bf16.mxu0 %v249_v0  ;;  %s135_s11 = sshll.u32 %s251_s2, 4  ;;  %s136_s11 = int_to_ptr.vmem [resolvable:$true] %s135_s11 }
  0x2a   :  { %s217_s12 = scalar_lea.vmem %s136_s11, 128  ;;  %p222_p3 = scmp.lt.s32.totalorder %s136_s11, %s136_s11 }
  0x2b   :  { %p218_p2 = scmp.ne.s32.totalorder %s136_s11, %s217_s12  ;;  %p223_p4 = scmp.lt.s32.totalorder %s217_s12, %s217_s12 }
  0x2d   :  { %p224_p5 = por %p223_p4, %p222_p3 }
  0x2f   :  { %p225_p6 = pnand %p224_p5, %p218_p2 }
  0x30   :  { %155 = vmatpush3.bf16.xpose.msra.mxu0 %v72_v4 }
  0x37   :  { %157 = vmatmul.mubr.msk.bf16.vlgmr.msra.gmra.mrb[0].mxu0 %vm64_vm1, %v42_v5 }
 0x10a   :  { %v108_v7 = vpop.f32.mrb[0].mxu0 }
 0x10b   :  { %v109_v8 = vadd.f32 %v145_v6, %v108_v7  ;;  %v158_v9 = vpop.f32.mrb[1].mxu0 }
 0x10c   :  { %v111_v10 = vpop.f32.mrb[2].mxu0 }
 0x10d   :  { %v159_v11 = vpop.f32.mrb[3].mxu0  ;;  %v114_v12 = vmul.f32 %v109_v8, %v109_v8 }
 0x10f   :  { %v115_v13 = vsel %vm64_vm1, %v114_v12, 0.0 }
 0x110   :  { %116 = vadd.xlane.f32.xlu0 %v115_v13 }
 0x19d   :  { %v117_v14 = vpop.xlane.xlu0 %116 }
 0x19e   :  { %169 = vrsqrt.f32 %v117_v14  ;;  %vm120_vm2 = vcmp.eq.f32.partialorder %v117_v14, inf  ;;  %v123_v17 = vand.u32 2147483648, %v117_v14  ;;  %vm122_vm3 = vcmp.eq.f32.partialorder %v117_v14, 0.0 }
 0x1a8   :  { %v170_v15 = vpop.eup %169 }
 0x1a9   :  { %v119_v16 = vmul.f32 %v170_v15, %v117_v14 }
 0x1ab   :  { %v121_v18 = vsel %vm120_vm2, %v117_v14, %v119_v16 }
 0x1ac   :  { %v124_v19 = vsel %vm122_vm3, %v123_v17, %v121_v18 }
 0x1ad   :  { %v125_v20 = vadd.f32 1e-08, %v124_v19 }
 0x1af   :  { %171 = vrcp.f32 %v125_v20 }
 0x1b9   :  { %v172_v21 = vpop.eup %171 }
 0x1ba   :  { %v127_v22 = vmul.f32 %v172_v21, %v109_v8 }
 0x1bc   :  { %128 = vst.msk [vmem:[#allocation7] sm:$0xff] %vm64_vm1, %v127_v22 }
 0x1bd   :  { %228 = shalt.err (!%p225_p6)
}
 0x1be   :  { %s229_s15 = scalar_lea.hbm %s326_s3, 128 }
 0x1bf   :  { %p230_p7 = scmp.ne.s32.totalorder %s326_s3, %s229_s15  ;;  %p233_p8 = scmp.lt.u32.totalorder %s229_s15, %s326_s3 }
 0x1c1   :  { %p235_p9 = pnand %p233_p8, %p230_p7 }
 0x1c3   :  { %238 = shalt.err (!%p235_p9)
}
 0x1c4   :  { %138 = dma.vmem_to_hbm [thread:$0]  %s136_s11, 128, %s326_s3, [#allocation4]  }
 0x1c5   :  { %243 = dma.done.wait [#allocation4], 128  }
 0x1c6   :  { %244 = vsyncadd [#allocation4], 4294967168 }
 0x1c7   :  { %142 = vsyncpa [#allocation3], 1 }
 0x1c8   :  { %143 = vsyncpa [#allocation6], 1 }
 0x1c9   :  { %144 = vsyncpa [#allocation4], 1 }

</bundles_post_ra>
